<compile_context>
chip_gen: v5e
topology: v5e:2x2
jax: 0.10.0
libtpu: 0.0.40
codegen_flags: <defaults>
</compile_context>

<pallas_src>
import jax
import jax.numpy as jnp
from jax.experimental import pallas as pl
from jax.experimental.pallas import tpu as pltpu


def _sw_kernel(x_ref, w_ref, t_ref, o_ref):
    # x_ref: (Nb, C, HW)  -- C on sublanes, HW on lanes, native dtype
    # w_ref: (2C, 2C)     -- block-diag [wl | wg] pre-transposed, BN scale and
    #                        1/HW folded in
    # t_ref: (1, 2C)      -- folded conv bias + BN shift for both branches
    x = x_ref[...]                                         # native dtype
    nb, c, _ = x.shape

    # Global adaptive pools to 1x1 == reductions over the spatial (lane) axis.
    # Pools / matmul accumulate in f32; the big element-wise path stays in the
    # input dtype (no full-block upcast).
    maxp = jnp.max(x, axis=2).astype(jnp.float32)          # (Nb, C)
    sump = jnp.sum(x, axis=2, dtype=jnp.float32)           # (Nb, C)  (1/HW in w)
    pooled = jnp.concatenate([maxp, sump], axis=1)         # (Nb, 2C)

    # Both 1x1 convs + BN + ReLU in a single fused MXU push.
    att2 = jnp.maximum(
        jnp.dot(pooled, w_ref[...], preferred_element_type=jnp.float32)
        + t_ref[...], 0.0)                                 # (Nb, 2C)
    att = att2[:, :c] + att2[:, c:]                        # (Nb, C) local+global

    y = att.astype(x.dtype)[:, :, None] + x                # (Nb, C, HW)
    # sigmoid(y) == 0.5 * (tanh(0.5 * y) + 1): one EUP tanh + two VALU ops.
    gate = 0.5 * (jnp.tanh(0.5 * y) + 1.0)
    o_ref[...] = (x * gate).astype(o_ref.dtype)


def sw_forward(x_nchw, params):
    """x_nchw: (N, C, H, W). Returns (N, C, H, W)."""
    N, C, H, W = x_nchw.shape
    HW = H * W
    # NCHW -> (N, C, HW) is a free reshape (no data movement).
    x = x_nchw.reshape(N, C, HW)

    eps = 1e-5

    def fold(w, b, gamma, beta, rmean, rvar, spatial_scale=1.0):
        # Fold inference BN into the 1x1 conv: scale into weight columns,
        # bias + shift into one per-channel vector.  spatial_scale folds the
        # 1/HW of the average pool into the weight (sum-pool in the kernel).
        scale = gamma / jnp.sqrt(rvar + eps)                       # (C,)
        wT = (w.T * scale[None, :]) * spatial_scale                # (C, C)
        shift = beta + scale * (b - rmean)                         # (C,)
        return wT.astype(jnp.float32), shift.astype(jnp.float32)

    wl, tl = fold(params["wl"], params["bl"], params["gl"], params["betal"],
                  params["ml"], params["vl"])
    wg, tg = fold(params["wg"], params["bg"], params["gg"], params["betag"],
                  params["mg"], params["vg"], spatial_scale=1.0 / HW)

    # Fuse both branches into one block-diagonal (2C, 2C) weight + (1, 2C) shift.
    wcat = jnp.zeros((2 * C, 2 * C), jnp.float32)
    wcat = wcat.at[:C, :C].set(wl).at[C:, C:].set(wg)
    tcat = jnp.concatenate([tl, tg]).reshape(1, 2 * C)

    # ---- Tiling: block size first, grid points second -----------------------
    itemsize = jnp.dtype(x_nchw.dtype).itemsize
    bytes_per_sample = C * HW * itemsize

    # Generation-aware VMEM budget (v7x: 64 MiB physical vs 128 MiB v5e/v6e).
    try:
        vmem_phys = int(getattr(pltpu.get_tpu_info(), "vmem_capacity_bytes",
                                64 * 1024 * 1024))
    except Exception:
        vmem_phys = 64 * 1024 * 1024
    vmem_limit = min(vmem_phys // 2, 64 * 1024 * 1024)
    # in + out blocks, each double-buffered (~4 resident blocks) + headroom.
    block_budget = max(2 * 1024 * 1024, min(8 * 1024 * 1024, vmem_limit // 5))

    nb = max(1, min(block_budget // max(bytes_per_sample, 1), N))
    # Only shrink the block to guarantee >=2 grid points (v7x megacore + DMA
    # pipeline overlap) -- never collapse block size for extra grid points.
    if N >= 2 and pl.cdiv(N, nb) < 2:
        nb = pl.cdiv(N, 2)
    grid = (pl.cdiv(N, nb),)   # last block may be batch-padded; rows are dropped

    x_spec = pl.BlockSpec((nb, C, HW), lambda b: (b, 0, 0))
    w_spec = pl.BlockSpec((2 * C, 2 * C), lambda b: (0, 0))
    t_spec = pl.BlockSpec((1, 2 * C), lambda b: (0, 0))

    out = pl.pallas_call(
        _sw_kernel,
        out_shape=jax.ShapeDtypeStruct((N, C, HW), x_nchw.dtype),
        grid_spec=pltpu.PrefetchScalarGridSpec(
            num_scalar_prefetch=0,
            grid=grid,
            in_specs=[x_spec, w_spec, t_spec],
            out_specs=x_spec,
        ),
        compiler_params=pltpu.CompilerParams(
            dimension_semantics=("parallel",),
            vmem_limit_bytes=vmem_limit),
    )(x, wcat, tcat)

    return out.reshape(N, C, H, W)


def sw_reference(x_nchw, params):
    """Pure-JAX reference mirroring the PyTorch forward (BN in eval mode)."""
    eps = 1e-5

    def branch(pooled, w, b, gamma, beta, rmean, rvar):
        y = pooled @ w.T + b
        y = (y - rmean) / jnp.sqrt(rvar + eps) * gamma + beta
        return jnp.maximum(y, 0.0)

    maxp = jnp.max(x_nchw, axis=(2, 3))
    avgp = jnp.mean(x_nchw, axis=(2, 3))
    local = branch(maxp, params["wl"], params["bl"], params["gl"],
                   params["betal"], params["ml"], params["vl"])
    globl = branch(avgp, params["wg"], params["bg"], params["gg"],
                   params["betag"], params["mg"], params["vg"])
    att = (local + globl)[:, :, None, None]
    fusion = jax.nn.sigmoid(att + x_nchw)
    return x_nchw * fusion


if __name__ == "__main__":
    key = jax.random.PRNGKey(0)
    # HW = 256 (multiple of 128) -> lane-dense stores in the (N, C, HW) layout.
    N, C, H, W = 2, 32, 16, 16

    keys = jax.random.split(key, 16)
    x = jax.random.normal(keys[0], (N, C, H, W), dtype=jnp.float32)

    # Deterministic synthetic parameters: Conv2d(C, C, 1) weights stored as
    # (C, C); BatchNorm2d affine + running stats.
    params = {
        "wl": jax.random.normal(keys[1], (C, C), jnp.float32) * 0.1,
        "bl": jax.random.normal(keys[2], (C,), jnp.float32) * 0.1,
        "gl": 1.0 + 0.1 * jax.random.normal(keys[3], (C,), jnp.float32),
        "betal": 0.1 * jax.random.normal(keys[4], (C,), jnp.float32),
        "ml": 0.05 * jax.random.normal(keys[5], (C,), jnp.float32),
        "vl": 1.0 + 0.1 * jax.random.uniform(keys[6], (C,), jnp.float32),
        "wg": jax.random.normal(keys[7], (C, C), jnp.float32) * 0.1,
        "bg": jax.random.normal(keys[8], (C,), jnp.float32) * 0.1,
        "gg": 1.0 + 0.1 * jax.random.normal(keys[9], (C,), jnp.float32),
        "betag": 0.1 * jax.random.normal(keys[10], (C,), jnp.float32),
        "mg": 0.05 * jax.random.normal(keys[11], (C,), jnp.float32),
        "vg": 1.0 + 0.1 * jax.random.uniform(keys[12], (C,), jnp.float32),
    }

    out = jax.block_until_ready(sw_forward(x, params))
    ref = jax.block_until_ready(sw_reference(x, params))

    assert out.shape == (N, C, H, W)
    assert jnp.allclose(out, ref, atol=1e-4, rtol=1e-4), (
        f"max abs err {jnp.max(jnp.abs(out - ref))}")
    print("KERNEL_OK")
</pallas_src>

<mosaic_0001>
module attributes {stable_mosaic.version = 11 : i64} {
  func.func @_sw_kernel(%arg0: i32, %arg1: memref<1x32x256xf32, #tpu.memory_space<vmem>>, %arg2: memref<64x64xf32, #tpu.memory_space<vmem>>, %arg3: memref<1x64xf32, #tpu.memory_space<vmem>>, %arg4: memref<1x32x256xf32, #tpu.memory_space<vmem>>) attributes {dimension_semantics = [#tpu.dimension_semantics<parallel>], iteration_bounds = array<i64: 2>, scalar_prefetch = 0 : i64, scratch_operands = 0 : i64, tpu.core_type = #tpu.core_type<tc>, window_params = [{transform_indices = @transform_0, window_bounds = array<i64: 1, 32, 256>}, {pipeline_mode = #tpu.pipeline_mode<synchronous>, transform_indices = @transform_1, window_bounds = array<i64: 64, 64>}, {pipeline_mode = #tpu.pipeline_mode<synchronous>, transform_indices = @transform_2, window_bounds = array<i64: 1, 64>}, {transform_indices = @transform_3, window_bounds = array<i64: 1, 32, 256>}]} {
    %c0 = arith.constant 0 : index
    %c0_0 = arith.constant 0 : index
    %c0_1 = arith.constant 0 : index
    %0 = vector.load %arg1[%c0, %c0_0, %c0_1] : memref<1x32x256xf32, #tpu.memory_space<vmem>>, vector<1x32x256xf32>
    %cst = arith.constant dense<0xFF800000> : vector<1x32xf32>
    %1 = vector.multi_reduction <maximumf>, %0, %cst [2] : vector<1x32x256xf32> to vector<1x32xf32>
    %cst_2 = arith.constant dense<0.000000e+00> : vector<1x32xf32>
    %2 = vector.multi_reduction <add>, %0, %cst_2 [2] : vector<1x32x256xf32> to vector<1x32xf32>
    %3 = tpu.concatenate %1, %2 in 1 : vector<1x32xf32>, vector<1x32xf32> -> vector<1x64xf32>
    %c0_3 = arith.constant 0 : index
    %c0_4 = arith.constant 0 : index
    %4 = vector.load %arg2[%c0_3, %c0_4] : memref<64x64xf32, #tpu.memory_space<vmem>>, vector<64x64xf32>
    %cst_5 = arith.constant dense<0.000000e+00> : vector<1x64xf32>
    %5 = tpu.matmul %3, %4, %cst_5 {dimension_numbers = #tpu.dot_dimension_numbers<[1], [0], [0], [1], [0, 0, 1, 1], [], []>} : vector<1x64xf32>, vector<64x64xf32>, vector<1x64xf32> -> vector<1x64xf32>
    %c0_6 = arith.constant 0 : index
    %c0_7 = arith.constant 0 : index
    %6 = vector.load %arg3[%c0_6, %c0_7] : memref<1x64xf32, #tpu.memory_space<vmem>>, vector<1x64xf32>
    %7 = arith.addf %5, %6 : vector<1x64xf32>
    %cst_8 = arith.constant 0.000000e+00 : f32
    %8 = vector.broadcast %cst_8 : f32 to vector<1x64xf32>
    %9 = arith.maximumf %7, %8 : vector<1x64xf32>
    %10 = vector.extract_strided_slice %9 {offsets = [0, 0], sizes = [1, 32], strides = [1, 1]} : vector<1x64xf32> to vector<1x32xf32>
    %11 = vector.extract_strided_slice %9 {offsets = [0, 32], sizes = [1, 32], strides = [1, 1]} : vector<1x64xf32> to vector<1x32xf32>
    %12 = arith.addf %10, %11 : vector<1x32xf32>
    %13 = vector.shape_cast %12 : vector<1x32xf32> to vector<1x32x1xf32>
    %14 = vector.broadcast %13 : vector<1x32x1xf32> to vector<1x32x256xf32>
    %15 = arith.addf %14, %0 : vector<1x32x256xf32>
    %cst_9 = arith.constant 5.000000e-01 : f32
    %16 = vector.broadcast %cst_9 : f32 to vector<1x32x256xf32>
    %17 = arith.mulf %16, %15 : vector<1x32x256xf32>
    %18 = math.tanh %17 : vector<1x32x256xf32>
    %cst_10 = arith.constant 1.000000e+00 : f32
    %19 = vector.broadcast %cst_10 : f32 to vector<1x32x256xf32>
    %20 = arith.addf %18, %19 : vector<1x32x256xf32>
    %cst_11 = arith.constant 5.000000e-01 : f32
    %21 = vector.broadcast %cst_11 : f32 to vector<1x32x256xf32>
    %22 = arith.mulf %21, %20 : vector<1x32x256xf32>
    %23 = arith.mulf %0, %22 : vector<1x32x256xf32>
    %c0_12 = arith.constant 0 : index
    %c0_13 = arith.constant 0 : index
    %c0_14 = arith.constant 0 : index
    %24 = vector.load %arg4[%c0_12, %c0_13, %c0_14] : memref<1x32x256xf32, #tpu.memory_space<vmem>>, vector<1x32x256xf32>
    tpu.vector_store %arg4[%c0_12, %c0_13, %c0_14], %23 {strides = array<i32>} : memref<1x32x256xf32, #tpu.memory_space<vmem>>, vector<1x32x256xf32>,
    return
  }
  func.func @transform_0(%arg0: i32) -> (i32, i32, i32) {
    %c0_i32 = arith.constant 0 : i32
    %c0_i32_0 = arith.constant 0 : i32
    %c0_i32_1 = arith.constant 0 : i32
    return %arg0, %c0_i32, %c0_i32_0 : i32, i32, i32
  }
  func.func @transform_1(%arg0: i32) -> (i32, i32) {
    %c0_i32 = arith.constant 0 : i32
    %c0_i32_0 = arith.constant 0 : i32
    %c0_i32_1 = arith.constant 0 : i32
    return %c0_i32, %c0_i32_0 : i32, i32
  }
  func.func @transform_2(%arg0: i32) -> (i32, i32) {
    %c0_i32 = arith.constant 0 : i32
    %c0_i32_0 = arith.constant 0 : i32
    %c0_i32_1 = arith.constant 0 : i32
    return %c0_i32, %c0_i32_0 : i32, i32
  }
  func.func @transform_3(%arg0: i32) -> (i32, i32, i32) {
    %c0_i32 = arith.constant 0 : i32
    %c0_i32_0 = arith.constant 0 : i32
    %c0_i32_1 = arith.constant 0 : i32
    return %arg0, %c0_i32, %c0_i32_0 : i32, i32, i32
  }
}

</mosaic_0001>

<bundles_post_ra>
// kernel: tpu_custom_call.1
= control target key start
LH: loop header
LB: loop body
LE: loop exit
PB: predicated region body
PF: predicated region fallthrough
CT: control target
= control target key end

     0   :  { %8 = vsyncpa [#allocation3], 0  ;;  %s970_s0 = inlined_call_operand.hbm [shape: f32[2,32,256], index: 0, kind: input, shape index: {}]   ;;  %s971_s1 = inlined_call_operand.hbm [shape: f32[64,64], index: 1, kind: input, shape index: {}]   ;;  %s972_s2 = inlined_call_operand.vmem [shape: f32[1,64], index: 2, kind: input, shape index: {}]   ;;  %s973_s3 = inlined_call_operand.hbm [shape: f32[2,32,256], index: 3, kind: output, shape index: {}]  }
   0x1   :  { %10 = vsyncpa [#allocation3 + $0x1], 0 }
   0x2   :  { %11 = vsyncpa [#allocation6], 0 }
   0x3   :  { %12 = vsyncpa [#allocation4], 0 }
   0x4   :  { %14 = vsyncpa [#allocation4 + $0x1], 0  ;;  %s764_s12 = smov 0   ;;  %s766_s13 = smov 0  }
   0x5   :  { %s768_s14 = smov 0   ;;  %s770_s15 = smov 0  }
   0x6 LB: > { %s785_s16 = sadd.s32 4294967295, %s734_s15   ;;  %s500_s17 = sadd.s32 4294967294, %s734_s15   ;;  %s734_s15 = sphi %s770_s15, %s983_s15   ;;  %s730_s14 = sphi %s768_s14, %s982_s14   ;;  %s726_s13 = sphi %s766_s13, %s981_s13   ;;  %s722_s12 = sphi %s764_s12, %s980_s12  }
   0x7   : > { %p40_p0 = scmp.ne.s32.totalorder %s726_s13, %s722_s12  ;;  %p41_p1 = scmp.eq.s32.totalorder %s785_s16, 0 }
   0x8   : > { %p106_p2 = scmp.eq.s32.totalorder %s785_s16, 1  ;;  %p112_p3 = scmp.eq.s32.totalorder %s500_s17, 1 }
   0x9   : > { %p794_p4 = por %p41_p1, %p40_p0  ;;  %p501_p5 = scmp.ge.s32.totalorder %s734_s15, 1 }
   0xa   : > { %p799_p6 = por %p112_p3, %p40_p0  ;;  %p119_p7 = scmp.lt.s32.totalorder %s734_s15, 3 }
   0xb   : > { %s130_s22 = sshll.u32 %s971_s1, 4  ;;  %s736_s24 = smov [#allocation5]   ;;  %s131_s22 = int_to_ptr.hbm [resolvable:$true] %s130_s22 }
   0xc   : > { %p807_p8 = pnand %p501_p5, %p119_p7  ;;  %s132_s25 = sshll.u32 %s736_s24, 4  ;;  %s133_s25 = int_to_ptr.vmem [resolvable:$true] %s132_s25 }
   0xd   : > { %s817_s26 = sadd.s32 1, %s734_s15   ;;  %s737_s27 = smov 128  }
   0xe   : > { %p527_p9 = pneg %p807_p8  ;;  %s738_s28 = smov 8  }
   0xf   : > { %s24_s29 = ssub.s32 %s734_s15, %s817_s26  ;;  %s27_s30 = sadd.s32 1, %s730_s14 }
  0x10   : > { %p528_p10 = pnand %p527_p9, %p41_p1  ;;  %p25_p12 = scmp.eq.s32.totalorder %s24_s29, 0 }
  0x11   : > { %p34_p13 = scmp.ne.s32.totalorder %s730_s14, %s726_s13  ;;  %p35_p0 = scmp.eq.s32.totalorder %s734_s15, 0 }
  0x12   : > { %530 = dma.hbm_to_vmem [thread:$0]  (!%p528_p10), %s131_s22, 1024, %s133_s25, [#allocation6], %s737_s27, %s737_s27, %s738_s28  }
  0x13   : > { %p540_p3 = scmp.lt.s32.totalorder %s734_s15, 2  ;;  %p36_p5 = por %p35_p0, %p34_p13 }
  0x14   : > { %s827_s4 = scalar_select %p25_p12, %s730_s14, %s27_s30  }
  0x15   : > { %p831_p7 = por %p106_p2, %p34_p13  ;;  %s149_s6 = sand.u32 1, %s730_s14  }
  0x16   : > { %s517_s7 = sshll.u32 %s734_s15, 6  ;;  %s504_s8 = sshll.u32 %s149_s6, 6 }
  0x17   : > { %s158_s11 = scalar_lea.hbm %s970_s0, %s517_s7  ;;  %s153_s20 = scalar_lea.vmem [#allocation2], %s504_s8 }
  0x18   : > { %s159_s17 = sshll.u32 %s158_s11, 4  ;;  %s161_s21 = sshll.u32 %s153_s20, 4  ;;  %s160_s17 = int_to_ptr.hbm [resolvable:$true] %s159_s17  ;;  %s162_s21 = int_to_ptr.vmem [resolvable:$true] %s161_s21 }
  0x19   : > { %p842_p9 = pnand %p540_p3, %p36_p5  ;;  %s150_s24 = scalar_lea.sflag [#allocation3], %s149_s6 }
  0x1a   : > { %s634_s25 = sshra.s32 %s160_s17, 4  ;;  %s641_s30 = scalar_lea.hbm %s970_s0, 128  ;;  %s635_s25 = int_to_ptr.hbm [resolvable:$true] %s634_s25 }
  0x1b   : > { %s636_s27 = scalar_lea.hbm %s635_s25, 64  ;;  %p638_p10 = pneg %p842_p9 }
  0x1c   : > { %p637_p2 = scmp.ne.s32.totalorder %s635_s25, %s636_s27  ;;  %p642_p0 = scmp.lt.s32.totalorder %s635_s25, %s970_s0 }
  0x1d   : > { %p643_p3 = scmp.lt.s32.totalorder %s641_s30, %s636_s27 }
  0x1e   : > { %p639_p12 = pnand %p638_p10, %p637_p2 }
  0x1f   : > { %p644_p5 = por %p643_p3, %p642_p0 }
  0x20   : > { %p640_p13 = pneg %p639_p12 }
  0x22   : > { %p645_p11 = pnand %p644_p5, %p640_p13 }
  0x24   : > { %648 = shalt.err (!%p645_p11)
}
  0x25   : > { %s739_s6 = smov 256   ;;  %s740_s9 = smov 16  }
  0x26   : > { %534 = dma.hbm_to_vmem [thread:$0]  (!%p842_p9), %s160_s17, 1024, %s162_s21, %s150_s24, %s739_s6, %s739_s6, %s740_s9  }
  0x27   : > { %173 = sbr.rel (%p807_p8) target bundleno = 550 (0x226), region = 32  ;;  %s859_s10 = sand.u32 (!%p807_p8), 1, %s726_s13  }
  0x28   : > { %s508_s11 = sshll.u32 (!%p807_p8), %s859_s10, 6  ;;  %s176_s20 = scalar_lea.sflag (!%p807_p8), [#allocation3], %s859_s10 }
  0x29   : > { %s179_s25 = scalar_lea.vmem (!%p807_p8), [#allocation2], %s508_s11 }
  0x2c   : > { %709 = dma.done.wait (%p794_p4), %s176_s20, 1024  }
  0x2d   : > { %711 = vsyncadd (%p794_p4), %s176_s20, 4294966272 }
  0x2e   : > { %713 = dma.done.wait (%p41_p1), [#allocation6], 1024  }
  0x2f   : > { %715 = vsyncadd (%p41_p1), [#allocation6], 4294966272  ;;  %v873_v0 = vld [vmem:[%s179_s25] sm:$0xff]  ;;  %v875_v1 = vld [vmem:[%s179_s25 + $0x8] sm:$0xff]  ;;  %v244_v26 = vlaneseq  ;;  %vm268_vm0 = vcmask 392512   ;;  %vm249_vm1 = vcmask 130112  }
  0x30   : > { %v877_v2 = vld [vmem:[%s179_s25 + $0x20] sm:$0xff]  ;;  %v228_v3 = vadd.f32 %v875_v1, %v873_v0  ;;  %v216_v4 = vmax.f32 %v873_v0, %v875_v1  ;;  %v883_v5 = vld [vmem:[%s179_s25 + $0x28] sm:$0xff]  ;;  %v887_v7 = vld [vmem:[%s179_s25 + $0x10] sm:$0xff]  ;;  %vm272_vm2 = vcmask 458112   ;;  %vm253_vm3 = vcmask 195712   ;;  %s741_s17 = smov 96  }
  0x31   : > { %v222_v6 = vmax.f32 %v877_v2, %v883_v5  ;;  %v889_v8 = vld [vmem:[%s179_s25 + $0x18] sm:$0xff]  ;;  %v234_v11 = vadd.f32 %v883_v5, %v877_v2  ;;  %v897_v12 = vld [vmem:[%s179_s25 + $0x30] sm:$0xff]  ;;  %v286_v18 = vld [vmem:[#allocation5 + $0x28] sm:$0xff]  ;;  %v245_v28 = vand.u32 127, %v244_v26  ;;  %vm257_vm4 = vcmask 261312   ;;  %s916_s21 = scalar_lea.vmem [#allocation7], %s508_s11 }
  0x32   : > { %229 = vadd.xlane.f32.xlu1 %v228_v3  ;;  %217 = vmax.xlane.f32.xlu0 %v216_v4  ;;  %v231_v9 = vadd.f32 %v889_v8, %v887_v7  ;;  %v219_v10 = vmax.f32 %v887_v7, %v889_v8  ;;  %v899_v13 = vld [vmem:[%s179_s25 + $0x38] sm:$0xff]  ;;  %v287_v17 = vld [vmem:[#allocation5 + $0x30] sm:$0xff]  ;;  %v285_v19 = vld [vmem:[#allocation5 + $0x20] sm:$0xff]  ;;  %vm276_vm5 = vcmask 523712   ;;  %vm279_vm6 = vcmask 261120   ;;  %s518_s22 = sshll.u32 %s785_s16, 6 }
  0x33   : > { %223 = vmax.xlane.f32.xlu2 %v222_v6  ;;  %v237_v14 = vadd.f32 %v899_v13, %v897_v12  ;;  %v225_v15 = vmax.f32 %v897_v12, %v899_v13  ;;  %v288_v16 = vld [vmem:[#allocation5 + $0x38] sm:$0xff]  ;;  %v283_v21 = vld [vmem:[#allocation5 + $0x10] sm:$0xff]  ;;  %v282_v22 = vld [vmem:[#allocation5 + $0x8] sm:$0xff]  ;;  %v266_v29 = vadd.s32 4294967256, %v245_v28  ;;  %v247_v30 = vadd.s32 4294967288, %v245_v28  ;;  %s413_s28 = scalar_lea.hbm %s973_s3, %s518_s22  ;;  %s414_s16 = sshll.u32 %s916_s21, 4  ;;  %s415_s16 = int_to_ptr.vmem [resolvable:$true] %s414_s16 }
  0x34   : > { %302 = vmatpush.msra.mxu0 %v288_v16  ;;  %v284_v20 = vld [vmem:[#allocation5 + $0x18] sm:$0xff]  ;;  %v281_v23 = vld [vmem:[#allocation5] sm:$0xff]  ;;  %v264_v33 = vadd.s32 4294967264, %v245_v28  ;;  %v270_v34 = vadd.s32 4294967248, %v245_v28  ;;  %v251_v38 = vadd.s32 4294967280, %v245_v28  ;;  %v274_v41 = vadd.s32 4294967240, %v245_v28 }
  0x35   : > { %v255_v42 = vadd.s32 4294967272, %v245_v28  ;;  %vm290_vm7 = vcmask 523264   ;;  %v322_v56 = vshrl.u32 %v244_v26, 7  ;;  %v289_v59 = vld [vmem:[%s972_s2] sm:$0x1]  ;;  %s416_s29 = sshll.u32 %s413_s28, 4  ;;  %s417_s29 = int_to_ptr.hbm [resolvable:$true] %s416_s29 }
  0x36   : > { %303 = vmatpush.msra.mxu0 %v287_v17  ;;  %s402_s30 = scalar_lea.sflag [#allocation4], %s859_s10  ;;  %s678_s7 = sshra.s32 %s417_s29, 4  ;;  %s679_s7 = int_to_ptr.hbm [resolvable:$true] %s678_s7 }
  0x37   : > { %583 = vset.pattern.permute.xlu0 %v322_v56  ;;  %v335_v57 = vadd.s32 16, %v322_v56  ;;  %v329_v58 = vadd.s32 8, %v322_v56  ;;  %v341_v6 = vadd.s32 24, %v322_v56  ;;  %s680_s8 = scalar_lea.hbm %s679_s7, 64  ;;  %s684_s11 = scalar_lea.hbm %s973_s3, 128 }
  0x38   : > { %304 = vmatpush.msra.mxu0 %v286_v18  ;;  %p681_p1 = scmp.ne.s32.totalorder %s679_s7, %s680_s8  ;;  %p685_p11 = scmp.lt.s32.totalorder %s679_s7, %s973_s3 }
  0x39   : > { %585 = vset.pattern.permute.xlu2 %v335_v57  ;;  %584 = vset.pattern.permute.xlu1 %v329_v58  ;;  %p686_p9 = scmp.lt.s32.totalorder %s684_s11, %s680_s8 }
  0x3a   : > { %232 = vadd.xlane.f32.xlu1 %v231_v9  ;;  %220 = vmax.xlane.f32.xlu0 %v219_v10  ;;  %p682_p4 = pnand %p681_p1, %p831_p7 }
  0x3b   : > { %235 = vadd.xlane.f32.xlu2 %v234_v11  ;;  %305 = vmatpush.msra.mxu0 %v285_v19  ;;  %p687_p2 = por %p686_p9, %p685_p11 }
  0x3c   : > { %p683_p8 = pneg %p682_p4 }
  0x3d   : > { %306 = vmatpush.msra.mxu0 %v284_v20 }
  0x3e   : > { %p688_p10 = pnand %p687_p2, %p683_p8 }
  0x3f   : > { %307 = vmatpush.msra.mxu0 %v283_v21 }
  0x41   : > { %308 = vmatpush.msra.mxu0 %v282_v22 }
  0x42   : > { %238 = vadd.xlane.f32.xlu1 %v237_v14  ;;  %226 = vmax.xlane.f32.xlu0 %v225_v15 }
  0x43   : > { %309 = vmatpush.msra.mxu0 %v281_v23 }
  0xa5   : > { %v230_v24 = vpop.xlane.xlu1 %229  ;;  %v218_v25 = vpop.xlane.xlu0 %217 }
  0xa6   : > { %v224_v27 = vpop.xlane.xlu2 %223  ;;  %v265_v39 = vperm.slane %v230_v24, %v264_v33  ;;  %v246_v40 = vperm.slane %v218_v25, %v245_v28 }
  0xa7   : > { %v252_v46 = vperm.slane %v224_v27, %v251_v38 }
  0xad   : > { %v233_v31 = vpop.xlane.xlu1 %232  ;;  %v221_v32 = vpop.xlane.xlu0 %220 }
  0xae   : > { %v267_v35 = vperm.slane %v233_v31, %v266_v29  ;;  %v248_v36 = vperm.slane %v221_v32, %v247_v30  ;;  %v236_v37 = vpop.xlane.xlu2 %235 }
  0xaf   : > { %v271_v43 = vperm.slane %v236_v37, %v270_v34 }
  0xb0   : > { %v269_v44 = vsel %vm268_vm0, %v267_v35, %v265_v39  ;;  %v250_v45 = vsel %vm249_vm1, %v248_v36, %v246_v40 }
  0xb1   : > { %v273_v51 = vsel %vm272_vm2, %v271_v43, %v269_v44  ;;  %v254_v52 = vsel %vm253_vm3, %v252_v46, %v250_v45 }
  0xb5   : > { %v239_v47 = vpop.xlane.xlu1 %238  ;;  %v227_v48 = vpop.xlane.xlu0 %226 }
  0xb6   : > { %v275_v49 = vperm.slane %v239_v47, %v274_v41  ;;  %v256_v50 = vperm.slane %v227_v48, %v255_v42 }
  0xb8   : > { %v258_v53 = vsel %vm257_vm4, %v256_v50, %v254_v52  ;;  %v277_v54 = vsel %vm276_vm5, %v275_v49, %v273_v51 }
  0xb9   : > { %v280_v55 = vsel %vm279_vm6, %v258_v53, %v277_v54 }
  0xba   : > { %511 = vmatmul.msk.f32.vlgmr.msra.gmra.mxu0 %vm290_vm7, %v280_v55 }
 0x137   : > { %v311_v60 = vpop.f32.mrf.mxu0 }
 0x138   : > { %v312_v61 = vadd.f32 %v311_v60, %v289_v59 }
 0x13a   : > { %v314_v62 = vmax.f32 %v312_v61, 0.0 }
 0x13c   : > { %316 = vrot.lane.b32.xlu2 %v314_v62, %s741_s17 }
 0x196   : > { %v317_v63 = vpop.permute.xlu2 %316 }
 0x197   : > { %v319_v3 = vadd.f32 %v317_v63, %v314_v62 }
 0x199   : > { %v320_v4 = vperm.slane %v319_v3, 0 }
 0x19b   : > { %337 = vperm.xlu2 %585, %v320_v4   ;;  %331 = vperm.xlu1 %584, %v320_v4  }
 0x19c   : > { %325 = vperm.xlu0 %583, %v320_v4  }
 0x1a3   : > { %586 = vset.pattern.permute.xlu2 %v341_v6 }
 0x1a4   : > { %587 = vset.pattern.permute.xlu0 %v341_v6 }
 0x1ab   : > { %343 = vperm.xlu2 %586, %v320_v4  }
 0x1f5   : > { %v338_v9 = vpop.permute.xlu2 %337 }
 0x1f6   : > { %v349_v10 = vadd.f32 %v338_v9, %v877_v2  ;;  %v350_v11 = vadd.f32 %v338_v9, %v883_v5 }
 0x1f8   : > { %v357_v14 = vmul.f32 0.5, %v349_v10  ;;  %v358_v15 = vmul.f32 0.5, %v350_v11 }
 0x1fa   : > { %588 = vtanh.f32 %v357_v14 }
 0x1fb   : > { %590 = vtanh.f32 %v358_v15 }
 0x200   : > { %v589_v16 = vpop.eup %588 }
 0x201   : > { %v591_v17 = vpop.eup %590  ;;  %v373_v18 = vadd.f32 1.0, %v589_v16 }
 0x202   : > { %v374_v19 = vadd.f32 1.0, %v591_v17 }
 0x203   : > { %v381_v20 = vmul.f32 0.5, %v373_v18 }
 0x204   : > { %v382_v21 = vmul.f32 0.5, %v374_v19 }
 0x205   : > { %v389_v22 = vmul.f32 %v381_v20, %v877_v2  ;;  %v344_v23 = vpop.permute.xlu2 %343 }
 0x206   : > { %v390_v24 = vmul.f32 %v382_v21, %v883_v5  ;;  %v351_v25 = vadd.f32 %v344_v23, %v897_v12  ;;  %v352_v26 = vadd.f32 %v344_v23, %v899_v13 }
 0x207   : > { %397 = vst [vmem:[%s916_s21 + $0x20] sm:$0xff] %v389_v22 }
 0x208   : > { %398 = vst [vmem:[%s916_s21 + $0x28] sm:$0xff] %v390_v24  ;;  %v359_v27 = vmul.f32 0.5, %v351_v25  ;;  %v360_v28 = vmul.f32 0.5, %v352_v26 }
 0x20a   : > { %592 = vtanh.f32 %v359_v27 }
 0x20b   : > { %594 = vtanh.f32 %v360_v28 }
 0x20d   : > { %v332_v29 = vpop.permute.xlu1 %331 }
 0x20e   : > { %v347_v2 = vadd.f32 %v332_v29, %v887_v7  ;;  %v348_v5 = vadd.f32 %v332_v29, %v889_v8  ;;  %v326_v30 = vpop.permute.xlu0 %325 }
 0x20f   : > { %v345_v31 = vadd.f32 %v326_v30, %v873_v0  ;;  %v346_v32 = vadd.f32 %v326_v30, %v875_v1 }
 0x210   : > { %v593_v33 = vpop.eup %592  ;;  %v355_v34 = vmul.f32 0.5, %v347_v2  ;;  %v356_v35 = vmul.f32 0.5, %v348_v5 }
 0x211   : > { %v595_v36 = vpop.eup %594  ;;  %v375_v37 = vadd.f32 1.0, %v593_v33  ;;  %v353_v38 = vmul.f32 0.5, %v345_v31  ;;  %v354_v39 = vmul.f32 0.5, %v346_v32 }
 0x212   : > { %v376_v40 = vadd.f32 1.0, %v595_v36  ;;  %596 = vtanh.f32 %v355_v34 }
 0x213   : > { %v383_v41 = vmul.f32 0.5, %v375_v37  ;;  %598 = vtanh.f32 %v356_v35 }
 0x214   : > { %v384_v42 = vmul.f32 0.5, %v376_v40  ;;  %600 = vtanh.f32 %v353_v38 }
 0x215   : > { %v391_v43 = vmul.f32 %v383_v41, %v897_v12  ;;  %602 = vtanh.f32 %v354_v39 }
 0x216   : > { %v392_v44 = vmul.f32 %v384_v42, %v899_v13 }
 0x217   : > { %399 = vst [vmem:[%s916_s21 + $0x30] sm:$0xff] %v391_v43 }
 0x218   : > { %v597_v45 = vpop.eup %596  ;;  %400 = vst [vmem:[%s916_s21 + $0x38] sm:$0xff] %v392_v44 }
 0x219   : > { %v599_v46 = vpop.eup %598  ;;  %v371_v47 = vadd.f32 1.0, %v597_v45 }
 0x21a   : > { %v601_v48 = vpop.eup %600  ;;  %v372_v49 = vadd.f32 1.0, %v599_v46 }
 0x21b   : > { %v603_v50 = vpop.eup %602  ;;  %v379_v12 = vmul.f32 0.5, %v371_v47  ;;  %v369_v51 = vadd.f32 1.0, %v601_v48 }
 0x21c   : > { %v380_v13 = vmul.f32 0.5, %v372_v49  ;;  %v370_v52 = vadd.f32 1.0, %v603_v50 }
 0x21d   : > { %v387_v53 = vmul.f32 %v379_v12, %v887_v7  ;;  %v377_v54 = vmul.f32 0.5, %v369_v51 }
 0x21e   : > { %v388_v55 = vmul.f32 %v380_v13, %v889_v8  ;;  %v378_v56 = vmul.f32 0.5, %v370_v52 }
 0x21f   : > { %395 = vst [vmem:[%s916_s21 + $0x10] sm:$0xff] %v387_v53  ;;  %v385_v57 = vmul.f32 %v377_v54, %v873_v0 }
 0x220   : > { %396 = vst [vmem:[%s916_s21 + $0x18] sm:$0xff] %v388_v55  ;;  %v386_v58 = vmul.f32 %v378_v56, %v875_v1 }
 0x221   : > { %393 = vst [vmem:[%s916_s21] sm:$0xff] %v385_v57 }
 0x222   : > { %394 = vst [vmem:[%s916_s21 + $0x8] sm:$0xff] %v386_v58 }
 0x223   : > { %691 = shalt.err (!%p688_p10)
}
 0x224   : > { %s742_s10 = smov 256   ;;  %s743_s18 = smov 16  }
 0x225   : > { %525 = dma.vmem_to_hbm [thread:$0]  (%p831_p7), %s415_s16, 1024, %s417_s29, %s402_s30, %s742_s10, %s742_s10, %s743_s18  }
 0x226 PF: > { %s431_s23 = sand.u32 1, %s722_s12   ;;  %p979_p12 = scmp.ge.s32.totalorder %s734_s15, 2 }
 0x227   : > { %s432_s17 = scalar_lea.sflag [#allocation4], %s431_s23 }
 0x228   : > { %p536_p13 = pnand %p979_p12, %p799_p6 }
 0x22a   : > { %p537_p0 = pneg %p536_p13 }
 0x22c   : > { %717 = dma.done.wait (%p537_p0), %s432_s17, 1024  }
 0x22d   : > { %719 = vsyncadd (%p537_p0), %s432_s17, 4294966272  ;;  %p17_p3 = scmp.ge.s32.totalorder %s817_s26, 4   ;;  %s980_s12 = smov %s726_s13 }
 0x22e   : > { %s981_s13 = smov %s730_s14  ;;  %s982_s14 = smov %s827_s4 }
 0x22f   : > { %s983_s15 = smov %s817_s26  ;;  %19 = sbr.rel (!%p17_p3) target bundleno = 6 (0x6), region = 81 }
 0x234   :  { %438 = vsyncpa [#allocation3], 1 }
 0x235   :  { %440 = vsyncpa [#allocation3 + $0x1], 1 }
 0x236   :  { %441 = vsyncpa [#allocation6], 1 }
 0x237   :  { %442 = vsyncpa [#allocation4], 1 }
 0x238   :  { %444 = vsyncpa [#allocation4 + $0x1], 1 }

</bundles_post_ra>
